<compile_context>
chip_gen: v6e
topology: v6e:2x2x1
jax: 0.10.0
libtpu: 0.0.40
codegen_flags: <defaults>
</compile_context>

<pallas_src>
import functools

import jax
import jax.numpy as jnp
from jax.experimental import pallas as pl
from jax.experimental.pallas import tpu as pltpu


def bert_output_kernel(h_ref, w_ref, b_ref, res_ref, gamma_ref, beta_ref, o_ref,
                       *, eps, compute_dtype):
    # Dense: (tm, I) @ (I, H) on the MXU with f32 accumulation.
    # Cast the streamed activation tile in VMEM (free under the MXU); the resident
    # weight was cast once in the wrapper.
    x = jnp.dot(h_ref[...].astype(compute_dtype), w_ref[...],
                preferred_element_type=jnp.float32)
    x = x + b_ref[...].astype(jnp.float32)            # bias broadcast (1, H)
    # Dropout: identity at inference time.
    x = x + res_ref[...].astype(jnp.float32)          # residual added at full precision
    # LayerNorm (TF-style, eps inside the sqrt), reduced over the hidden (lane) axis.
    u = jnp.mean(x, axis=-1, keepdims=True)
    xc = x - u
    s = jnp.mean(xc * xc, axis=-1, keepdims=True)
    xn = xc * jax.lax.rsqrt(s + eps)                  # rsqrt -> EUP slot (free under MXU)
    y = gamma_ref[...].astype(jnp.float32) * xn + beta_ref[...].astype(jnp.float32)
    o_ref[...] = y.astype(o_ref.dtype)


def _round_up(x, m):
    return ((x + m - 1) // m) * m


def bert_output(hidden_states, input_tensor, w, b, gamma, beta, *,
                eps=1e-12, tm=None, compute_dtype=jnp.bfloat16, out_dtype=None,
                vmem_limit_bytes=None, single_buffer_invariants=True):
    """hidden_states: (B, S, I); input_tensor: (B, S, H); w: (I, H) (= W_pt.T);
    b, gamma, beta: (H,).

    tm: row-tile size.  None -> hardware-aware default (1024 on 128-MiB-VMEM chips,
        512 otherwise), then capped so the grid keeps >= 2 steps (v7x megacore).
    compute_dtype: MXU operand dtype (bf16 default; f32 accumulation + f32 LayerNorm).
    out_dtype: output dtype (defaults to input_tensor.dtype; pass bf16 to halve store
        traffic if the surrounding model runs in bf16).
    """
    B, S, I = hidden_states.shape
    H = input_tensor.shape[-1]
    if out_dtype is None:
        out_dtype = input_tensor.dtype
    M = B * S

    # ---- Hardware-aware defaults (tile size & VMEM limit). ----
    try:
        vmem_cap = int(pltpu.get_tpu_info().vmem_capacity_bytes)
    except Exception:
        vmem_cap = 64 * 1024 * 1024                    # conservative fallback (v7x-sized)
    if tm is None:
        tm = 1024 if vmem_cap >= 96 * 1024 * 1024 else 512
    if vmem_limit_bytes is None:
        # Never request the full physical VMEM; leave headroom for compiler scratch.
        vmem_limit_bytes = min(64 * 1024 * 1024, int(0.75 * vmem_cap))

    # Cap tm so the grid has >= 2 steps when possible (v7x two-TC sharding) and stays
    # 8-aligned; pad rows so the grid divides evenly.
    if M > 8:
        tm_cap = _round_up(pl.cdiv(M, 2), 8)
    else:
        tm_cap = _round_up(max(M, 1), 8)
    tm = max(8, min(tm, tm_cap))
    M_pad = _round_up(M, tm)
    grid = (M_pad // tm,)

    # ---- Input prep: NO dtype casts on the big activations (reshape is free). ----
    h2 = hidden_states.reshape(M, I)
    r2 = input_tensor.reshape(M, H)
    if M_pad != M:
        h2 = jnp.pad(h2, ((0, M_pad - M), (0, 0)))
        r2 = jnp.pad(r2, ((0, M_pad - M), (0, 0)))
    w2 = w if w.dtype == jnp.dtype(compute_dtype) else w.astype(compute_dtype)   # small, one-time
    b2 = b.reshape(1, H).astype(jnp.float32)
    g2 = gamma.reshape(1, H).astype(jnp.float32)
    be2 = beta.reshape(1, H).astype(jnp.float32)

    out_itemsize = jnp.dtype(out_dtype).itemsize
    bytes_accessed = (h2.size * h2.dtype.itemsize + r2.size * r2.dtype.itemsize
                      + w2.size * w2.dtype.itemsize + 3 * H * 4
                      + M_pad * H * out_itemsize)
    cost = pl.CostEstimate(flops=2 * M_pad * I * H,
                           transcendentals=M_pad,          # one rsqrt per row
                           bytes_accessed=bytes_accessed)

    kernel = functools.partial(bert_output_kernel, eps=eps, compute_dtype=compute_dtype)

    def _run(single_buffer):
        # Grid-invariant operands: single-buffer them (their block index never changes),
        # halving the resident weight's VMEM footprint.
        inv_kwargs = {"pipeline_mode": pl.Buffered(1)} if single_buffer else {}
        in_specs = [
            pl.BlockSpec((tm, I), lambda i: (i, 0)),                  # streamed hidden tile
            pl.BlockSpec((I, H), lambda i: (0, 0), **inv_kwargs),     # resident dense weight
            pl.BlockSpec((1, H), lambda i: (0, 0), **inv_kwargs),     # dense bias
            pl.BlockSpec((tm, H), lambda i: (i, 0)),                  # streamed residual tile
            pl.BlockSpec((1, H), lambda i: (0, 0), **inv_kwargs),     # layernorm gamma
            pl.BlockSpec((1, H), lambda i: (0, 0), **inv_kwargs),     # layernorm beta
        ]
        out_specs = pl.BlockSpec((tm, H), lambda i: (i, 0))
        fn = pl.pallas_call(
            kernel,
            out_shape=jax.ShapeDtypeStruct((M_pad, H), out_dtype),
            grid_spec=pltpu.PrefetchScalarGridSpec(
                num_scalar_prefetch=0,
                grid=grid,
                in_specs=in_specs,
                out_specs=out_specs,
            ),
            compiler_params=pltpu.CompilerParams(
                dimension_semantics=("parallel",),
                vmem_limit_bytes=vmem_limit_bytes,
            ),
            cost_estimate=cost,
        )
        return fn(h2, w2, b2, r2, g2, be2)

    if single_buffer_invariants:
        try:
            out = jax.block_until_ready(_run(True))
        except Exception:
            # Fallback for jax versions that reject pl.Buffered(1) on pallas_call specs.
            out = _run(False)
    else:
        out = _run(False)

    if M_pad != M:
        out = out[:M]
    return out.reshape(B, S, H)


def reference(hidden_states, input_tensor, w, b, gamma, beta, eps=1e-12):
    x = jnp.einsum("bsi,ih->bsh", hidden_states, w) + b
    x = x + input_tensor
    u = jnp.mean(x, axis=-1, keepdims=True)
    s = jnp.mean((x - u) ** 2, axis=-1, keepdims=True)
    x = (x - u) / jnp.sqrt(s + eps)
    return gamma * x + beta


if __name__ == "__main__":
    key = jax.random.PRNGKey(0)
    # Small but lane-aligned shapes: H multiple of 128 so output stores are lane-dense.
    B, S, I, H = 2, 8, 256, 128   # batch, seq, intermediate_size, hidden_size

    k1, k2, k3, k4 = jax.random.split(key, 4)
    hidden_states = jax.random.normal(k1, (B, S, I), dtype=jnp.float32)
    input_tensor = jax.random.normal(k2, (B, S, H), dtype=jnp.float32)
    # Deterministic synthetic parameters: dense weight ~ N(0, 0.02), bias zeros,
    # LayerNorm weight ones / bias zeros (matches module __init__ semantics).
    w = 0.02 * jax.random.normal(k3, (I, H), dtype=jnp.float32)   # (intermediate, hidden) = W_pt.T
    b = jnp.zeros((H,), dtype=jnp.float32)
    gamma = jnp.ones((H,), dtype=jnp.float32)
    beta = jnp.zeros((H,), dtype=jnp.float32)

    ref = reference(hidden_states, input_tensor, w, b, gamma, beta)

    # 1) Exact-path check: f32 matmul operands, tight tolerance.
    out_f32 = bert_output(hidden_states, input_tensor, w, b, gamma, beta,
                          compute_dtype=jnp.float32)
    out_f32 = jax.block_until_ready(out_f32)
    assert out_f32.shape == (B, S, H)
    assert jnp.allclose(out_f32, ref, atol=1e-4, rtol=1e-4), "f32 kernel mismatch vs reference"

    # 2) Default fast path: bf16 MXU operands, f32 accumulation / LayerNorm, f32 residual.
    out_bf16 = bert_output(hidden_states, input_tensor, w, b, gamma, beta)
    out_bf16 = jax.block_until_ready(out_bf16)
    assert out_bf16.shape == (B, S, H)
    assert jnp.allclose(out_bf16, ref, atol=5e-2, rtol=5e-2), "bf16 kernel mismatch vs reference"

    print("KERNEL_OK")
</pallas_src>

<mosaic_0001>
module attributes {stable_mosaic.version = 11 : i64} {
  func.func @bert_output_kernel(%arg0: i32, %arg1: memref<8x256xf32, #tpu.memory_space<vmem>>, %arg2: memref<256x128xf32, #tpu.memory_space<vmem>>, %arg3: memref<1x128xf32, #tpu.memory_space<vmem>>, %arg4: memref<8x128xf32, #tpu.memory_space<vmem>>, %arg5: memref<1x128xf32, #tpu.memory_space<vmem>>, %arg6: memref<1x128xf32, #tpu.memory_space<vmem>>, %arg7: memref<8x128xf32, #tpu.memory_space<vmem>>) attributes {dimension_semantics = [#tpu.dimension_semantics<parallel>], iteration_bounds = array<i64: 2>, scalar_prefetch = 0 : i64, scratch_operands = 0 : i64, tpu.core_type = #tpu.core_type<tc>, window_params = [{transform_indices = @transform_0, window_bounds = array<i64: 8, 256>}, {pipeline_mode = #tpu.pipeline_mode<synchronous>, transform_indices = @transform_1, window_bounds = array<i64: 256, 128>}, {pipeline_mode = #tpu.pipeline_mode<synchronous>, transform_indices = @transform_2, window_bounds = array<i64: 1, 128>}, {transform_indices = @transform_3, window_bounds = array<i64: 8, 128>}, {pipeline_mode = #tpu.pipeline_mode<synchronous>, transform_indices = @transform_4, window_bounds = array<i64: 1, 128>}, {pipeline_mode = #tpu.pipeline_mode<synchronous>, transform_indices = @transform_5, window_bounds = array<i64: 1, 128>}, {transform_indices = @transform_6, window_bounds = array<i64: 8, 128>}]} {
    %c0 = arith.constant 0 : index
    %c0_0 = arith.constant 0 : index
    %0 = vector.load %arg1[%c0, %c0_0] : memref<8x256xf32, #tpu.memory_space<vmem>>, vector<8x256xf32>
    %c0_1 = arith.constant 0 : index
    %c0_2 = arith.constant 0 : index
    %1 = vector.load %arg2[%c0_1, %c0_2] : memref<256x128xf32, #tpu.memory_space<vmem>>, vector<256x128xf32>
    %cst = arith.constant dense<0.000000e+00> : vector<8x128xf32>
    %2 = tpu.matmul %0, %1, %cst {dimension_numbers = #tpu.dot_dimension_numbers<[1], [0], [0], [1], [0, 0, 1, 1], [], []>} : vector<8x256xf32>, vector<256x128xf32>, vector<8x128xf32> -> vector<8x128xf32>
    %c0_3 = arith.constant 0 : index
    %c0_4 = arith.constant 0 : index
    %3 = vector.load %arg3[%c0_3, %c0_4] : memref<1x128xf32, #tpu.memory_space<vmem>>, vector<1x128xf32>
    %4 = vector.broadcast %3 : vector<1x128xf32> to vector<8x128xf32>
    %5 = arith.addf %2, %4 : vector<8x128xf32>
    %c0_5 = arith.constant 0 : index
    %c0_6 = arith.constant 0 : index
    %6 = vector.load %arg4[%c0_5, %c0_6] : memref<8x128xf32, #tpu.memory_space<vmem>>, vector<8x128xf32>
    %7 = arith.addf %5, %6 : vector<8x128xf32>
    %cst_7 = arith.constant dense<0.000000e+00> : vector<8xf32>
    %8 = vector.multi_reduction <add>, %7, %cst_7 [1] : vector<8x128xf32> to vector<8xf32>
    %9 = vector.shape_cast %8 : vector<8xf32> to vector<8x1xf32>
    %cst_8 = arith.constant 1.280000e+02 : f32
    %10 = vector.broadcast %cst_8 : f32 to vector<8x1xf32>
    %11 = arith.divf %9, %10 : vector<8x1xf32>
    %12 = vector.broadcast %11 : vector<8x1xf32> to vector<8x128xf32>
    %13 = arith.subf %7, %12 : vector<8x128xf32>
    %14 = arith.mulf %13, %13 : vector<8x128xf32>
    %cst_9 = arith.constant dense<0.000000e+00> : vector<8xf32>
    %15 = vector.multi_reduction <add>, %14, %cst_9 [1] : vector<8x128xf32> to vector<8xf32>
    %16 = vector.shape_cast %15 : vector<8xf32> to vector<8x1xf32>
    %cst_10 = arith.constant 1.280000e+02 : f32
    %17 = vector.broadcast %cst_10 : f32 to vector<8x1xf32>
    %18 = arith.divf %16, %17 : vector<8x1xf32>
    %cst_11 = arith.constant 9.99999996E-13 : f32
    %19 = vector.broadcast %cst_11 : f32 to vector<8x1xf32>
    %20 = arith.addf %18, %19 : vector<8x1xf32>
    %21 = math.rsqrt %20 : vector<8x1xf32>
    %22 = vector.broadcast %21 : vector<8x1xf32> to vector<8x128xf32>
    %23 = arith.mulf %13, %22 : vector<8x128xf32>
    %c0_12 = arith.constant 0 : index
    %c0_13 = arith.constant 0 : index
    %24 = vector.load %arg5[%c0_12, %c0_13] : memref<1x128xf32, #tpu.memory_space<vmem>>, vector<1x128xf32>
    %25 = vector.broadcast %24 : vector<1x128xf32> to vector<8x128xf32>
    %26 = arith.mulf %25, %23 : vector<8x128xf32>
    %c0_14 = arith.constant 0 : index
    %c0_15 = arith.constant 0 : index
    %27 = vector.load %arg6[%c0_14, %c0_15] : memref<1x128xf32, #tpu.memory_space<vmem>>, vector<1x128xf32>
    %28 = vector.broadcast %27 : vector<1x128xf32> to vector<8x128xf32>
    %29 = arith.addf %26, %28 : vector<8x128xf32>
    %c0_16 = arith.constant 0 : index
    %c0_17 = arith.constant 0 : index
    %30 = vector.load %arg7[%c0_16, %c0_17] : memref<8x128xf32, #tpu.memory_space<vmem>>, vector<8x128xf32>
    tpu.vector_store %arg7[%c0_16, %c0_17], %29 {strides = array<i32>} : memref<8x128xf32, #tpu.memory_space<vmem>>, vector<8x128xf32>,
    return
  }
  func.func @transform_0(%arg0: i32) -> (i32, i32) {
    %c0_i32 = arith.constant 0 : i32
    %c0_i32_0 = arith.constant 0 : i32
    return %arg0, %c0_i32 : i32, i32
  }
  func.func @transform_1(%arg0: i32) -> (i32, i32) {
    %c0_i32 = arith.constant 0 : i32
    %c0_i32_0 = arith.constant 0 : i32
    %c0_i32_1 = arith.constant 0 : i32
    return %c0_i32, %c0_i32_0 : i32, i32
  }
  func.func @transform_2(%arg0: i32) -> (i32, i32) {
    %c0_i32 = arith.constant 0 : i32
    %c0_i32_0 = arith.constant 0 : i32
    %c0_i32_1 = arith.constant 0 : i32
    return %c0_i32, %c0_i32_0 : i32, i32
  }
  func.func @transform_3(%arg0: i32) -> (i32, i32) {
    %c0_i32 = arith.constant 0 : i32
    %c0_i32_0 = arith.constant 0 : i32
    return %arg0, %c0_i32 : i32, i32
  }
  func.func @transform_4(%arg0: i32) -> (i32, i32) {
    %c0_i32 = arith.constant 0 : i32
    %c0_i32_0 = arith.constant 0 : i32
    %c0_i32_1 = arith.constant 0 : i32
    return %c0_i32, %c0_i32_0 : i32, i32
  }
  func.func @transform_5(%arg0: i32) -> (i32, i32) {
    %c0_i32 = arith.constant 0 : i32
    %c0_i32_0 = arith.constant 0 : i32
    %c0_i32_1 = arith.constant 0 : i32
    return %c0_i32, %c0_i32_0 : i32, i32
  }
  func.func @transform_6(%arg0: i32) -> (i32, i32) {
    %c0_i32 = arith.constant 0 : i32
    %c0_i32_0 = arith.constant 0 : i32
    return %arg0, %c0_i32 : i32, i32
  }
}

module attributes {stable_mosaic.version = 11 : i64} {
  func.func @bert_output_kernel(%arg0: i32, %arg1: memref<8x256xf32, #tpu.memory_space<vmem>>, %arg2: memref<256x128xf32, #tpu.memory_space<vmem>>, %arg3: memref<1x128xf32, #tpu.memory_space<vmem>>, %arg4: memref<8x128xf32, #tpu.memory_space<vmem>>, %arg5: memref<1x128xf32, #tpu.memory_space<vmem>>, %arg6: memref<1x128xf32, #tpu.memory_space<vmem>>, %arg7: memref<8x128xf32, #tpu.memory_space<vmem>>) attributes {dimension_semantics = [#tpu.dimension_semantics<parallel>], iteration_bounds = array<i64: 2>, scalar_prefetch = 0 : i64, scratch_operands = 0 : i64, tpu.core_type = #tpu.core_type<tc>, window_params = [{transform_indices = @transform_0, window_bounds = array<i64: 8, 256>}, {pipeline_mode = #tpu.pipeline_mode<synchronous>, transform_indices = @transform_1, window_bounds = array<i64: 256, 128>}, {pipeline_mode = #tpu.pipeline_mode<synchronous>, transform_indices = @transform_2, window_bounds = array<i64: 1, 128>}, {transform_indices = @transform_3, window_bounds = array<i64: 8, 128>}, {pipeline_mode = #tpu.pipeline_mode<synchronous>, transform_indices = @transform_4, window_bounds = array<i64: 1, 128>}, {pipeline_mode = #tpu.pipeline_mode<synchronous>, transform_indices = @transform_5, window_bounds = array<i64: 1, 128>}, {transform_indices = @transform_6, window_bounds = array<i64: 8, 128>}]} {
    %c0 = arith.constant 0 : index
    %c0_0 = arith.constant 0 : index
    %0 = vector.load %arg1[%c0, %c0_0] : memref<8x256xf32, #tpu.memory_space<vmem>>, vector<8x256xf32>
    %c0_1 = arith.constant 0 : index
    %c0_2 = arith.constant 0 : index
    %1 = vector.load %arg2[%c0_1, %c0_2] : memref<256x128xf32, #tpu.memory_space<vmem>>, vector<256x128xf32>
    %cst = arith.constant dense<0.000000e+00> : vector<8x128xf32>
    %2 = tpu.matmul %0, %1, %cst {dimension_numbers = #tpu.dot_dimension_numbers<[1], [0], [0], [1], [0, 0, 1, 1], [], []>} : vector<8x256xf32>, vector<256x128xf32>, vector<8x128xf32> -> vector<8x128xf32>
    %c0_3 = arith.constant 0 : index
    %c0_4 = arith.constant 0 : index
    %3 = vector.load %arg3[%c0_3, %c0_4] : memref<1x128xf32, #tpu.memory_space<vmem>>, vector<1x128xf32>
    %4 = vector.broadcast %3 : vector<1x128xf32> to vector<8x128xf32>
    %5 = arith.addf %2, %4 : vector<8x128xf32>
    %c0_5 = arith.constant 0 : index
    %c0_6 = arith.constant 0 : index
    %6 = vector.load %arg4[%c0_5, %c0_6] : memref<8x128xf32, #tpu.memory_space<vmem>>, vector<8x128xf32>
    %7 = arith.addf %5, %6 : vector<8x128xf32>
    %cst_7 = arith.constant dense<0.000000e+00> : vector<8xf32>
    %8 = vector.multi_reduction <add>, %7, %cst_7 [1] : vector<8x128xf32> to vector<8xf32>
    %9 = vector.shape_cast %8 : vector<8xf32> to vector<8x1xf32>
    %cst_8 = arith.constant 1.280000e+02 : f32
    %10 = vector.broadcast %cst_8 : f32 to vector<8x1xf32>
    %11 = arith.divf %9, %10 : vector<8x1xf32>
    %12 = vector.broadcast %11 : vector<8x1xf32> to vector<8x128xf32>
    %13 = arith.subf %7, %12 : vector<8x128xf32>
    %14 = arith.mulf %13, %13 : vector<8x128xf32>
    %cst_9 = arith.constant dense<0.000000e+00> : vector<8xf32>
    %15 = vector.multi_reduction <add>, %14, %cst_9 [1] : vector<8x128xf32> to vector<8xf32>
    %16 = vector.shape_cast %15 : vector<8xf32> to vector<8x1xf32>
    %cst_10 = arith.constant 1.280000e+02 : f32
    %17 = vector.broadcast %cst_10 : f32 to vector<8x1xf32>
    %18 = arith.divf %16, %17 : vector<8x1xf32>
    %cst_11 = arith.constant 9.99999996E-13 : f32
    %19 = vector.broadcast %cst_11 : f32 to vector<8x1xf32>
    %20 = arith.addf %18, %19 : vector<8x1xf32>
    %21 = math.rsqrt %20 : vector<8x1xf32>
    %22 = vector.broadcast %21 : vector<8x1xf32> to vector<8x128xf32>
    %23 = arith.mulf %13, %22 : vector<8x128xf32>
    %c0_12 = arith.constant 0 : index
    %c0_13 = arith.constant 0 : index
    %24 = vector.load %arg5[%c0_12, %c0_13] : memref<1x128xf32, #tpu.memory_space<vmem>>, vector<1x128xf32>
    %25 = vector.broadcast %24 : vector<1x128xf32> to vector<8x128xf32>
    %26 = arith.mulf %25, %23 : vector<8x128xf32>
    %c0_14 = arith.constant 0 : index
    %c0_15 = arith.constant 0 : index
    %27 = vector.load %arg6[%c0_14, %c0_15] : memref<1x128xf32, #tpu.memory_space<vmem>>, vector<1x128xf32>
    %28 = vector.broadcast %27 : vector<1x128xf32> to vector<8x128xf32>
    %29 = arith.addf %26, %28 : vector<8x128xf32>
    %c0_16 = arith.constant 0 : index
    %c0_17 = arith.constant 0 : index
    %30 = vector.load %arg7[%c0_16, %c0_17] : memref<8x128xf32, #tpu.memory_space<vmem>>, vector<8x128xf32>
    tpu.vector_store %arg7[%c0_16, %c0_17], %29 {strides = array<i32>} : memref<8x128xf32, #tpu.memory_space<vmem>>, vector<8x128xf32>,
    return
  }
  func.func @transform_0(%arg0: i32) -> (i32, i32) {
    %c0_i32 = arith.constant 0 : i32
    %c0_i32_0 = arith.constant 0 : i32
    return %arg0, %c0_i32 : i32, i32
  }
  func.func @transform_1(%arg0: i32) -> (i32, i32) {
    %c0_i32 = arith.constant 0 : i32
    %c0_i32_0 = arith.constant 0 : i32
    %c0_i32_1 = arith.constant 0 : i32
    return %c0_i32, %c0_i32_0 : i32, i32
  }
  func.func @transform_2(%arg0: i32) -> (i32, i32) {
    %c0_i32 = arith.constant 0 : i32
    %c0_i32_0 = arith.constant 0 : i32
    %c0_i32_1 = arith.constant 0 : i32
    return %c0_i32, %c0_i32_0 : i32, i32
  }
  func.func @transform_3(%arg0: i32) -> (i32, i32) {
    %c0_i32 = arith.constant 0 : i32
    %c0_i32_0 = arith.constant 0 : i32
    return %arg0, %c0_i32 : i32, i32
  }
  func.func @transform_4(%arg0: i32) -> (i32, i32) {
    %c0_i32 = arith.constant 0 : i32
    %c0_i32_0 = arith.constant 0 : i32
    %c0_i32_1 = arith.constant 0 : i32
    return %c0_i32, %c0_i32_0 : i32, i32
  }
  func.func @transform_5(%arg0: i32) -> (i32, i32) {
    %c0_i32 = arith.constant 0 : i32
    %c0_i32_0 = arith.constant 0 : i32
    %c0_i32_1 = arith.constant 0 : i32
    return %c0_i32, %c0_i32_0 : i32, i32
  }
  func.func @transform_6(%arg0: i32) -> (i32, i32) {
    %c0_i32 = arith.constant 0 : i32
    %c0_i32_0 = arith.constant 0 : i32
    return %arg0, %c0_i32 : i32, i32
  }
}

</mosaic_0001>

<bundles_post_ra>
// kernel: tpu_custom_call.1
= control target key start
LH: loop header
LB: loop body
LE: loop exit
PB: predicated region body
PF: predicated region fallthrough
CT: control target
= control target key end

     0   :  { %s1120_s0 = inlined_call_operand.hbm [shape: f32[16,256], index: 0, kind: input, shape index: {}]   ;;  %s1121_s1 = inlined_call_operand.hbm [shape: f32[256,128], index: 1, kind: input, shape index: {}]   ;;  %s1122_s2 = inlined_call_operand.vmem [shape: f32[1,128], index: 2, kind: input, shape index: {}]   ;;  %s1123_s3 = inlined_call_operand.hbm [shape: f32[16,128], index: 3, kind: input, shape index: {}]   ;;  %s1124_s4 = inlined_call_operand.vmem [shape: f32[1,128], index: 4, kind: input, shape index: {}]   ;;  %s1125_s5 = inlined_call_operand.vmem [shape: f32[1,128], index: 5, kind: input, shape index: {}]   ;;  %s1126_s6 = inlined_call_operand.hbm [shape: f32[16,128], index: 6, kind: output, shape index: {}]  }
   0x1   :  { %1133 = sst [smem:[#allocation15_spill]] %s1120_s0 }
   0x2   :  { %11 = vsyncpa [#allocation3], 0 }
   0x3   :  { %13 = vsyncpa [#allocation3 + $0x1], 0 }
   0x4   :  { %14 = vsyncpa [#allocation6], 0 }
   0x5   :  { %15 = vsyncpa [#allocation4], 0 }
   0x6   :  { %17 = vsyncpa [#allocation4 + $0x1], 0  ;;  %s893_s21 = smov 0   ;;  %s895_s22 = smov 0  }
   0x7   :  { %s897_s23 = smov 0   ;;  %s899_s24 = smov 0  }
   0x8 LB: > { %1134 = sst [smem:[#allocation13_spill]] %s846_s23  ;;  %s914_s25 = sadd.s32 1, %s850_s24   ;;  %s850_s24 = sphi %s899_s24, %s1156_s24   ;;  %s846_s23 = sphi %s897_s23, %s1153_s23   ;;  %s842_s22 = sphi %s895_s22, %s1155_s22   ;;  %s838_s21 = sphi %s893_s21, %s1154_s21  }
   0x9   : > { %s30_s26 = sadd.s32 1, %s846_s23  ;;  %s27_s27 = ssub.s32 %s850_s24, %s914_s25 }
   0xa   : > { %p1127_p0 = scmp.ne.s32.totalorder %s846_s23, %s842_s22  ;;  %p28_p1 = scmp.eq.s32.totalorder %s27_s27, 0 }
   0xb   : > { %p38_p2 = scmp.eq.s32.totalorder %s850_s24, 0  ;;  %p656_p4 = scmp.lt.s32.totalorder %s850_s24, 2 }
   0xc   : > { %s925_s28 = scalar_select %p28_p1, %s846_s23, %s30_s26  }
   0xd   : > { %p39_p5 = por %p38_p2, %p1127_p0  ;;  %s225_s29 = sand.u32 1, %s850_s24  }
   0xe   : > { %1135 = sst [smem:[#allocation14_spill]] %s925_s28  ;;  %s227_s30 = sand.u32 1, %s846_s23  }
   0xf   : > { %s577_s7 = sshll.u32 %s227_s30, 4  ;;  %s594_s8 = sshll.u32 %s850_s24, 8 }
  0x10   : > { %s1136_s0 = sld [smem:[#allocation15_spill]]  ;;  %s229_s12 = scalar_lea.vmem [#allocation2], %s577_s7 }
  0x11   : > { %s237_s13 = sshll.u32 %s229_s12, 4  ;;  %p938_p6 = pnand %p656_p4, %p39_p5  ;;  %s238_s13 = int_to_ptr.vmem [resolvable:$true] %s237_s13 }
  0x12   : > { %s942_s15 = sshll.u32 %s227_s30, 3  ;;  %s944_s16 = scalar_lea.sflag [#allocation3], %s225_s29 }
  0x13   : > { %p1129_p8 = pneg %p938_p6 }
  0x16   : > { %s936_s11 = scalar_lea.hbm %s1136_s0, %s594_s8  ;;  %s701_s20 = scalar_lea.hbm %s1136_s0, 512 }
  0x17   : > { %s696_s17 = scalar_lea.hbm %s936_s11, 256  ;;  %p702_p11 = scmp.lt.s32.totalorder %s936_s11, %s1136_s0 }
  0x18   : > { %p697_p7 = scmp.ne.s32.totalorder %s936_s11, %s696_s17  ;;  %p703_p12 = scmp.lt.s32.totalorder %s701_s20, %s696_s17 }
  0x1a   : > { %p699_p9 = pnand %p1129_p8, %p697_p7  ;;  %p704_p13 = por %p703_p12, %p702_p11 }
  0x1c   : > { %p700_p10 = pneg %p699_p9 }
  0x1e   : > { %p705_p1 = pnand %p704_p13, %p700_p10 }
  0x20   : > { %708 = shalt.err (!%p705_p1)
}
  0x21   : > { %s709_s29 = scalar_lea.vmem %s238_s13, 256  ;;  %s852_s30 = smov [#allocation2]  }
  0x22   : > { %p710_p2 = scmp.ne.s32.totalorder %s238_s13, %s709_s29  ;;  %s714_s7 = sshll.u32 %s852_s30, 4  ;;  %s715_s7 = int_to_ptr.vmem [resolvable:$false] %s714_s7 }
  0x23   : > { %s716_s8 = scalar_lea.vmem %s715_s7, 512  ;;  %p717_p7 = scmp.lt.s32.totalorder %s238_s13, %s715_s7 }
  0x24   : > { %p712_p4 = pnand %p710_p2, %p1129_p8  ;;  %p718_p9 = scmp.lt.s32.totalorder %s716_s8, %s709_s29 }
  0x26   : > { %p713_p5 = pneg %p712_p4  ;;  %p719_p3 = por %p718_p9, %p717_p7 }
  0x28   : > { %p720_p0 = pnand %p719_p3, %p713_p5 }
  0x2a   : > { %723 = shalt.err (!%p720_p0)
}
  0x2b   : > { %647 = dma.hbm_to_vmem [thread:$0]  (!%p938_p6), %s936_s11, 256, %s238_s13, %s944_s16  }
  0x2c   : > { %s968_s9 = sadd.s32 4294967295, %s850_s24   ;;  %s573_s10 = sadd.s32 4294967294, %s850_s24  }
  0x2d   : > { %p43_p0 = scmp.ne.s32.totalorder %s842_s22, %s838_s21  ;;  %p1128_p3 = scmp.eq.s32.totalorder %s968_s9, 0 }
  0x2e   : > { %p177_p10 = scmp.eq.s32.totalorder %s968_s9, 1  ;;  %p183_p11 = scmp.eq.s32.totalorder %s573_s10, 1 }
  0x2f   : > { %p574_p12 = scmp.ge.s32.totalorder %s850_s24, 1  ;;  %p978_p13 = por %p1128_p3, %p43_p0 }
  0x30   : > { %p1139_p1 = scmp.ne.s32.totalorder %s846_s23, %s842_s22  ;;  %p989_p4 = por %p183_p11, %p43_p0 }
  0x31   : > { %s1138_s12 = scalar_select %p978_p13, 1, 0 }
  0x32   : > { %p985_p2 = por %p177_p10, %p1139_p1  ;;  %p190_p5 = scmp.lt.s32.totalorder %s850_s24, 3 }
  0x33   : > { %s1141_s13 = scalar_select %p989_p4, 1, 0 }
  0x34   : > { %s1140_s11 = scalar_select %p985_p2, 1, 0 }
  0x35   : > { %p994_p7 = pnand %p574_p12, %p190_p5  ;;  %s853_s18 = smov [#allocation5]  }
  0x36   : > { %s202_s19 = sshll.u32 %s853_s18, 4  ;;  %s581_s20 = sshll.u32 %s850_s24, 7  ;;  %s203_s19 = int_to_ptr.vmem [resolvable:$true] %s202_s19 }
  0x37   : > { %p640_p9 = pneg %p994_p7  ;;  %s1010_s30 = scalar_lea.hbm %s1123_s3, %s581_s20 }
  0x38   : > { %s248_s7 = scalar_lea.vmem [#allocation7], %s942_s15  ;;  %s735_s10 = scalar_lea.vmem %s203_s19, 4096 }
  0x39   : > { %p1003_p10 = pnand %p640_p9, %p1128_p3  ;;  %s255_s8 = sshll.u32 %s248_s7, 4  ;;  %s1013_s8 = int_to_ptr.vmem [resolvable:$true] %s255_s8 }
  0x3a   : > { %p736_p11 = scmp.ne.s32.totalorder %s203_s19, %s735_s10  ;;  %p743_p5 = scmp.lt.s32.totalorder %s203_s19, %s203_s19 }
  0x3b   : > { %p726_p0 = pneg %p1003_p10  ;;  %p744_p9 = scmp.lt.s32.totalorder %s735_s10, %s735_s10 }
  0x3d   : > { %p738_p12 = pnand %p736_p11, %p726_p0  ;;  %p745_p3 = por %p744_p9, %p743_p5 }
  0x3f   : > { %p739_p1 = pneg %p738_p12 }
  0x41   : > { %p746_p8 = pnand %p745_p3, %p739_p1 }
  0x43   : > { %749 = shalt.err (!%p746_p8)
}
  0x44   : > { %s854_s18 = smov 128   ;;  %s855_s15 = smov 8  }
  0x45   : > { %643 = dma.hbm_to_vmem [thread:$0]  (!%p1003_p10), %s1121_s1, 4096, %s203_s19, [#allocation6], %s854_s18, %s854_s18, %s855_s15  }
  0x46   : > { %s750_s29 = scalar_lea.hbm %s1010_s30, 128  ;;  %p1144_p11 = pneg %p938_p6 }
  0x47   : > { %p751_p0 = scmp.ne.s32.totalorder %s1010_s30, %s750_s29  ;;  %s755_s0 = scalar_lea.hbm %s1123_s3, 256 }
  0x48   : > { %p756_p8 = scmp.lt.s32.totalorder %s1010_s30, %s1123_s3  ;;  %p757_p3 = scmp.lt.s32.totalorder %s755_s0, %s750_s29 }
  0x49   : > { %p753_p12 = pnand %p751_p0, %p1144_p11 }
  0x4a   : > { %p758_p1 = por %p757_p3, %p756_p8 }
  0x4b   : > { %p754_p5 = pneg %p753_p12 }
  0x4d   : > { %p759_p9 = pnand %p758_p1, %p754_p5 }
  0x4f   : > { %762 = shalt.err (!%p759_p9)
}
  0x50   : > { %s763_s19 = scalar_lea.vmem %s1013_s8, 128  ;;  %p1145_p0 = pmov %p1144_p11 }
  0x51   : > { %p764_p10 = scmp.ne.s32.totalorder %s1013_s8, %s763_s19  ;;  %s856_s26 = smov [#allocation7]  }
  0x52   : > { %s768_s18 = sshll.u32 %s856_s26, 4  ;;  %s769_s18 = int_to_ptr.vmem [resolvable:$false] %s768_s18 }
  0x53   : > { %p766_p11 = pnand %p764_p10, %p1145_p0  ;;  %s770_s15 = scalar_lea.vmem %s769_s18, 256 }
  0x54   : > { %p771_p4 = scmp.lt.s32.totalorder %s1013_s8, %s769_s18  ;;  %p772_p2 = scmp.lt.s32.totalorder %s770_s15, %s763_s19 }
  0x55   : > { %p767_p12 = pneg %p766_p11 }
  0x56   : > { %p773_p13 = por %p772_p2, %p771_p4 }
  0x58   : > { %p774_p8 = pnand %p773_p13, %p767_p12 }
  0x5a   : > { %777 = shalt.err (!%p774_p8)
}
  0x5b   : > { %650 = dma.hbm_to_vmem [thread:$0]  (!%p938_p6), %s1010_s30, 128, %s1013_s8, %s944_s16  }
  0x5c   : > { %264 = sbr.rel (%p994_p7) target bundleno = 657 (0x291), region = 44  ;;  %s266_s0 = sand.u32 (!%p994_p7), 1, %s968_s9  }
  0x5d   : > { %s1049_s23 = sand.u32 (!%p994_p7), 1, %s842_s22   ;;  %s267_s20 = scalar_lea.sflag (!%p994_p7), [#allocation3], %s266_s0 }
  0x5e   : > { %s583_s28 = sshll.u32 (!%p994_p7), %s1049_s23, 4  ;;  %p1146_p13 = scmp.ne.s32.totalorder (!%p994_p7), %s1138_s12, 0 }
  0x5f   : > { %s1052_s27 = scalar_lea.vmem (!%p994_p7), [#allocation2], %s583_s28 }
  0x61   : > { %821 = dma.done.wait (%p1146_p13), %s267_s20, 256  }
  0x62   : > { %823 = vsyncadd (%p1146_p13), %s267_s20, 4294967040  ;;  %p1147_p6 = scmp.eq.s32.totalorder %s968_s9, 0 }
  0x64   : > { %825 = dma.done.wait (%p1147_p6), [#allocation6], 4096   ;;  %p1148_p2 = pmov %p1147_p6 }
  0x65   : > { %s585_s14 = sshll.u32 %s1049_s23, 3 }
  0x66   : > { %827 = vsyncadd (%p1148_p2), [#allocation6], 4294963200  ;;  %s1065_s16 = scalar_lea.vmem [#allocation7], %s585_s14 }
  0x67   : > { %829 = dma.done.wait (%p1146_p13), %s267_s20, 128  }
  0x68   : > { %831 = vsyncadd (%p1146_p13), %s267_s20, 4294967168  ;;  %v350_v0 = vld [vmem:[#allocation5 + $0xf8] sm:$0xff]  ;;  %v349_v2 = vld [vmem:[#allocation5 + $0xf0] sm:$0xff]  ;;  %s591_s10 = sshll.u32 %s968_s9, 7  ;;  %s316_s19 = scalar_lea.vmem [#allocation8], %s585_s14 }
  0x69   : > { %v334_v1 = vld [vmem:[#allocation5 + $0x78] sm:$0xff]  ;;  %595 = vmatprep.subr.mxu0 %v350_v0  ;;  %v333_v3 = vld [vmem:[#allocation5 + $0x70] sm:$0xff]  ;;  %v348_v4 = vld [vmem:[#allocation5 + $0xe8] sm:$0xff]  ;;  %s473_s26 = sshll.u32 %s316_s19, 4  ;;  %s471_s0 = scalar_lea.hbm %s1126_s6, %s591_s10  ;;  %s474_s26 = int_to_ptr.vmem [resolvable:$true] %s473_s26 }
  0x6a   : > { %596 = vmatpush3.msra.mxu0 %v334_v1  ;;  %v332_v5 = vld [vmem:[#allocation5 + $0x68] sm:$0xff]  ;;  %v347_v6 = vld [vmem:[#allocation5 + $0xe0] sm:$0xff]  ;;  %v346_v8 = vld [vmem:[#allocation5 + $0xd8] sm:$0xff]  ;;  %s460_s28 = scalar_lea.sflag [#allocation4], %s1049_s23  ;;  %s778_s20 = scalar_lea.vmem %s474_s26, 128 }
  0x6b   : > { %597 = vmatprep.subr.mxu0 %v349_v2  ;;  %v331_v7 = vld [vmem:[#allocation5 + $0x60] sm:$0xff]  ;;  %v330_v9 = vld [vmem:[#allocation5 + $0x58] sm:$0xff]  ;;  %v345_v10 = vld [vmem:[#allocation5 + $0xd0] sm:$0xff]  ;;  %p779_p4 = scmp.ne.s32.totalorder %s474_s26, %s778_s20  ;;  %p1149_p7 = scmp.ne.s32.totalorder %s1140_s11, 0 }
  0x6c   : > { %598 = vmatpush3.msra.mxu0 %v333_v3  ;;  %v329_v11 = vld [vmem:[#allocation5 + $0x50] sm:$0xff]  ;;  %v344_v12 = vld [vmem:[#allocation5 + $0xc8] sm:$0xff]  ;;  %v343_v15 = vld [vmem:[#allocation5 + $0xc0] sm:$0xff] }
  0x6d   : > { %599 = vmatprep.subr.mxu0 %v348_v4  ;;  %v318_v13 = vld [vmem:[%s1052_s27 + $0x8] sm:$0xff]  ;;  %v327_v16 = vld [vmem:[#allocation5 + $0x40] sm:$0xff]  ;;  %v341_v19 = vld [vmem:[#allocation5 + $0xb0] sm:$0xff]  ;;  %p780_p5 = pnand %p779_p4, %p1149_p7 }
  0x6e   : > { %600 = vmatpush3.msra.mxu0 %v332_v5  ;;  %v328_v14 = vld [vmem:[#allocation5 + $0x48] sm:$0xff]  ;;  %422 = vmatprep.mubr.f32.mxu0 %v318_v13  ;;  %v342_v17 = vld [vmem:[#allocation5 + $0xb8] sm:$0xff]  ;;  %v325_v20 = vld [vmem:[#allocation5 + $0x30] sm:$0xff] }
  0x6f   : > { %601 = vmatprep.subr.mxu0 %v347_v6  ;;  %v326_v18 = vld [vmem:[#allocation5 + $0x38] sm:$0xff]  ;;  %v340_v21 = vld [vmem:[#allocation5 + $0xa8] sm:$0xff]  ;;  %v339_v23 = vld [vmem:[#allocation5 + $0xa0] sm:$0xff]  ;;  %p781_p3 = pneg %p780_p5 }
  0x70   : > { %602 = vmatpush3.msra.mxu0 %v331_v7  ;;  %v324_v22 = vld [vmem:[#allocation5 + $0x28] sm:$0xff]  ;;  %v323_v24 = vld [vmem:[#allocation5 + $0x20] sm:$0xff]  ;;  %v338_v25 = vld [vmem:[#allocation5 + $0x98] sm:$0xff] }
  0x71   : > { %603 = vmatprep.subr.mxu0 %v346_v8  ;;  %v322_v26 = vld [vmem:[#allocation5 + $0x18] sm:$0xff]  ;;  %v337_v27 = vld [vmem:[#allocation5 + $0x90] sm:$0xff]  ;;  %v336_v29 = vld [vmem:[#allocation5 + $0x88] sm:$0xff] }
  0x72   : > { %604 = vmatpush3.msra.mxu0 %v330_v9  ;;  %v321_v28 = vld [vmem:[#allocation5 + $0x10] sm:$0xff]  ;;  %v320_v30 = vld [vmem:[#allocation5 + $0x8] sm:$0xff]  ;;  %v335_v31 = vld [vmem:[#allocation5 + $0x80] sm:$0xff] }
  0x73   : > { %605 = vmatprep.subr.mxu0 %v345_v10  ;;  %v319_v32 = vld [vmem:[#allocation5] sm:$0xff] }
  0x74   : > { %606 = vmatpush3.msra.mxu0 %v329_v11  ;;  %v317_v33 = vld [vmem:[%s1052_s27] sm:$0xff]  ;;  %s857_s27 = smov [#allocation8]  }
  0x75   : > { %607 = vmatprep.subr.mxu0 %v344_v12  ;;  %v587_v35 = vld [vmem:[%s1122_s2] ss:$0 sm:$0xff] }
  0x76   : > { %608 = vmatpush3.msra.mxu0 %v328_v14  ;;  %v428_v38 = vld [vmem:[%s1065_s16] sm:$0xff]  ;;  %s782_s16 = sshll.u32 %s857_s27, 4  ;;  %s783_s16 = int_to_ptr.vmem [resolvable:$false] %s782_s16 }
  0x77   : > { %609 = vmatprep.subr.mxu0 %v343_v15  ;;  %v588_v49 = vld [vmem:[%s1124_s4] ss:$0 sm:$0xff]  ;;  %s784_s9 = scalar_lea.vmem %s783_s16, 256  ;;  %p785_p1 = scmp.lt.s32.totalorder %s474_s26, %s783_s16 }
  0x78   : > { %610 = vmatpush3.msra.mxu0 %v327_v16  ;;  %v589_v51 = vld [vmem:[%s1125_s5] ss:$0 sm:$0xff]  ;;  %p786_p9 = scmp.lt.s32.totalorder %s784_s9, %s778_s20 }
  0x79   : > { %611 = vmatprep.subr.mxu0 %v342_v17 }
  0x7a   : > { %612 = vmatpush3.msra.mxu0 %v326_v18  ;;  %p787_p10 = por %p786_p9, %p785_p1 }
  0x7b   : > { %613 = vmatprep.subr.mxu0 %v341_v19 }
  0x7c   : > { %614 = vmatpush3.msra.mxu0 %v325_v20  ;;  %p788_p0 = pnand %p787_p10, %p781_p3 }
  0x7d   : > { %615 = vmatprep.subr.mxu0 %v340_v21 }
  0x7e   : > { %616 = vmatpush3.msra.mxu0 %v324_v22 }
  0x7f   : > { %617 = vmatprep.subr.mxu0 %v339_v23 }
  0x80   : > { %618 = vmatpush3.msra.mxu0 %v323_v24 }
  0x81   : > { %619 = vmatprep.subr.mxu0 %v338_v25 }
  0x82   : > { %620 = vmatpush3.msra.mxu0 %v322_v26 }
  0x83   : > { %621 = vmatprep.subr.mxu0 %v337_v27 }
  0x84   : > { %622 = vmatpush3.msra.mxu0 %v321_v28 }
  0x85   : > { %623 = vmatprep.subr.mxu0 %v336_v29 }
  0x86   : > { %624 = vmatpush3.msra.mxu0 %v320_v30 }
  0x87   : > { %625 = vmatprep.subr.mxu0 %v335_v31 }
  0x88   : > { %626 = vmatpush3.msra.mxu0 %v319_v32 }
  0x89   : > { %423 = vmatmul.mubr.f32.vlgmr.msra.gmra.mxu0 %v317_v33 }
 0x149   : > { %v627_v34 = vpop.f32.mrf.mxu0 }
 0x14b   : > { %v628_v36 = vpop.f32.mrf.mxu0 }
 0x14c   : > { %v629_v37 = vadd.f32 %v628_v36, %v627_v34 }
 0x14e   : > { %v425_v39 = vadd.f32 %v629_v37, %v587_v35 }
 0x150   : > { %v429_v40 = vadd.f32 %v428_v38, %v425_v39 }
 0x152   : > { %430 = vadd.xlane.f32.xlu0 %v429_v40 }
 0x1db   : > { %v431_v41 = vpop.xlane.xlu0 %430 }
 0x1dc   : > { %v433_v42 = vmul.f32 0.0078125, %v431_v41 }
 0x1de   : > { %v434_v43 = vsub.f32 %v429_v40, %v433_v42 }
 0x1e0   : > { %v435_v44 = vmul.f32 %v434_v43, %v434_v43 }
 0x1e2   : > { %436 = vadd.xlane.f32.xlu0 %v435_v44 }
 0x26b   : > { %v437_v45 = vpop.xlane.xlu0 %436 }
 0x26c   : > { %v438_v46 = vmul.f32 0.0078125, %v437_v45 }
 0x26e   : > { %v439_v47 = vadd.f32 1e-12, %v438_v46 }
 0x270   : > { %694 = vrsqrt.f32 %v439_v47 }
 0x27d   : > { %v695_v48 = vpop.eup %694 }
 0x27e   : > { %v441_v50 = vmul.f32 %v695_v48, %v434_v43 }
 0x280   : > { %v449_v52 = vmul.f32 %v588_v49, %v441_v50 }
 0x282   : > { %v457_v53 = vadd.f32 %v589_v51, %v449_v52 }
 0x284   : > { %458 = vst [vmem:[%s316_s19] sm:$0xff] %v457_v53 }
 0x285   : > { %791 = shalt.err (!%p788_p0)
}
 0x286   : > { %s792_s14 = scalar_lea.hbm %s471_s0, 128  ;;  %s796_s17 = scalar_lea.hbm %s1126_s6, 256 }
 0x287   : > { %p793_p11 = scmp.ne.s32.totalorder %s471_s0, %s792_s14  ;;  %p797_p13 = scmp.lt.s32.totalorder %s471_s0, %s1126_s6 }
 0x288   : > { %p798_p6 = scmp.lt.s32.totalorder %s796_s17, %s792_s14 }
 0x289   : > { %p794_p12 = pnand %p793_p11, %p1149_p7 }
 0x28a   : > { %p799_p2 = por %p798_p6, %p797_p13 }
 0x28b   : > { %p795_p8 = pneg %p794_p12 }
 0x28d   : > { %p800_p4 = pnand %p799_p2, %p795_p8 }
 0x28f   : > { %803 = shalt.err (!%p800_p4)
}
 0x290   : > { %638 = dma.vmem_to_hbm [thread:$0]  (%p1149_p7), %s474_s26, 128, %s471_s0, %s460_s28  }
 0x291 PF: > { %s485_s29 = sand.u32 1, %s838_s21   ;;  %p1150_p5 = scmp.ne.s32.totalorder %s1141_s13, 0 }
 0x292   : > { %p1151_p3 = scmp.ge.s32.totalorder %s850_s24, 2  ;;  %s486_s7 = scalar_lea.sflag [#allocation4], %s485_s29 }
 0x294   : > { %p652_p1 = pnand %p1151_p3, %p1150_p5 }
 0x296   : > { %p653_p9 = pneg %p652_p1 }
 0x298   : > { %833 = dma.done.wait (%p653_p9), %s486_s7, 128  }
 0x299   : > { %835 = vsyncadd (%p653_p9), %s486_s7, 4294967168  ;;  %s1152_s10 = sld [smem:[#allocation13_spill]]  ;;  %p20_p10 = scmp.ge.s32.totalorder %s914_s25, 4  }
 0x29a   : > { %s1153_s23 = sld [smem:[#allocation14_spill]]  ;;  %s1154_s21 = smov %s842_s22 }
 0x29b   : > { %s1156_s24 = smov %s914_s25  ;;  %22 = sbr.rel (!%p20_p10) target bundleno = 8 (0x8), region = 104 }
 0x29f   : > { %s1155_s22 = smov %s1152_s10 }
 0x2a0   :  { %491 = vsyncpa [#allocation3], 1 }
 0x2a1   :  { %493 = vsyncpa [#allocation3 + $0x1], 1 }
 0x2a2   :  { %494 = vsyncpa [#allocation6], 1 }
 0x2a3   :  { %495 = vsyncpa [#allocation4], 1 }
 0x2a4   :  { %497 = vsyncpa [#allocation4 + $0x1], 1 }

// kernel: tpu_custom_call.1
= control target key start
LH: loop header
LB: loop body
LE: loop exit
PB: predicated region body
PF: predicated region fallthrough
CT: control target
= control target key end

     0   :  { %s1120_s0 = inlined_call_operand.hbm [shape: f32[16,256], index: 0, kind: input, shape index: {}]   ;;  %s1121_s1 = inlined_call_operand.hbm [shape: f32[256,128], index: 1, kind: input, shape index: {}]   ;;  %s1122_s2 = inlined_call_operand.vmem [shape: f32[1,128], index: 2, kind: input, shape index: {}]   ;;  %s1123_s3 = inlined_call_operand.hbm [shape: f32[16,128], index: 3, kind: input, shape index: {}]   ;;  %s1124_s4 = inlined_call_operand.vmem [shape: f32[1,128], index: 4, kind: input, shape index: {}]   ;;  %s1125_s5 = inlined_call_operand.vmem [shape: f32[1,128], index: 5, kind: input, shape index: {}]   ;;  %s1126_s6 = inlined_call_operand.hbm [shape: f32[16,128], index: 6, kind: output, shape index: {}]  }
   0x1   :  { %1133 = sst [smem:[#allocation15_spill]] %s1120_s0 }
   0x2   :  { %11 = vsyncpa [#allocation3], 0 }
   0x3   :  { %13 = vsyncpa [#allocation3 + $0x1], 0 }
   0x4   :  { %14 = vsyncpa [#allocation6], 0 }
   0x5   :  { %15 = vsyncpa [#allocation4], 0 }
   0x6   :  { %17 = vsyncpa [#allocation4 + $0x1], 0  ;;  %s893_s21 = smov 0   ;;  %s895_s22 = smov 0  }
   0x7   :  { %s897_s23 = smov 0   ;;  %s899_s24 = smov 0  }
   0x8 LB: > { %1134 = sst [smem:[#allocation13_spill]] %s846_s23  ;;  %s914_s25 = sadd.s32 1, %s850_s24   ;;  %s850_s24 = sphi %s899_s24, %s1156_s24   ;;  %s846_s23 = sphi %s897_s23, %s1153_s23   ;;  %s842_s22 = sphi %s895_s22, %s1155_s22   ;;  %s838_s21 = sphi %s893_s21, %s1154_s21  }
   0x9   : > { %s30_s26 = sadd.s32 1, %s846_s23  ;;  %s27_s27 = ssub.s32 %s850_s24, %s914_s25 }
   0xa   : > { %p1127_p0 = scmp.ne.s32.totalorder %s846_s23, %s842_s22  ;;  %p28_p1 = scmp.eq.s32.totalorder %s27_s27, 0 }
   0xb   : > { %p38_p2 = scmp.eq.s32.totalorder %s850_s24, 0  ;;  %p656_p4 = scmp.lt.s32.totalorder %s850_s24, 2 }
   0xc   : > { %s925_s28 = scalar_select %p28_p1, %s846_s23, %s30_s26  }
   0xd   : > { %p39_p5 = por %p38_p2, %p1127_p0  ;;  %s225_s29 = sand.u32 1, %s850_s24  }
   0xe   : > { %1135 = sst [smem:[#allocation14_spill]] %s925_s28  ;;  %s227_s30 = sand.u32 1, %s846_s23  }
   0xf   : > { %s577_s7 = sshll.u32 %s227_s30, 4  ;;  %s594_s8 = sshll.u32 %s850_s24, 8 }
  0x10   : > { %s1136_s0 = sld [smem:[#allocation15_spill]]  ;;  %s229_s12 = scalar_lea.vmem [#allocation2], %s577_s7 }
  0x11   : > { %s237_s13 = sshll.u32 %s229_s12, 4  ;;  %p938_p6 = pnand %p656_p4, %p39_p5  ;;  %s238_s13 = int_to_ptr.vmem [resolvable:$true] %s237_s13 }
  0x12   : > { %s942_s15 = sshll.u32 %s227_s30, 3  ;;  %s944_s16 = scalar_lea.sflag [#allocation3], %s225_s29 }
  0x13   : > { %p1129_p8 = pneg %p938_p6 }
  0x16   : > { %s936_s11 = scalar_lea.hbm %s1136_s0, %s594_s8  ;;  %s701_s20 = scalar_lea.hbm %s1136_s0, 512 }
  0x17   : > { %s696_s17 = scalar_lea.hbm %s936_s11, 256  ;;  %p702_p11 = scmp.lt.s32.totalorder %s936_s11, %s1136_s0 }
  0x18   : > { %p697_p7 = scmp.ne.s32.totalorder %s936_s11, %s696_s17  ;;  %p703_p12 = scmp.lt.s32.totalorder %s701_s20, %s696_s17 }
  0x1a   : > { %p699_p9 = pnand %p1129_p8, %p697_p7  ;;  %p704_p13 = por %p703_p12, %p702_p11 }
  0x1c   : > { %p700_p10 = pneg %p699_p9 }
  0x1e   : > { %p705_p1 = pnand %p704_p13, %p700_p10 }
  0x20   : > { %708 = shalt.err (!%p705_p1)
}
  0x21   : > { %s709_s29 = scalar_lea.vmem %s238_s13, 256  ;;  %s852_s30 = smov [#allocation2]  }
  0x22   : > { %p710_p2 = scmp.ne.s32.totalorder %s238_s13, %s709_s29  ;;  %s714_s7 = sshll.u32 %s852_s30, 4  ;;  %s715_s7 = int_to_ptr.vmem [resolvable:$false] %s714_s7 }
  0x23   : > { %s716_s8 = scalar_lea.vmem %s715_s7, 512  ;;  %p717_p7 = scmp.lt.s32.totalorder %s238_s13, %s715_s7 }
  0x24   : > { %p712_p4 = pnand %p710_p2, %p1129_p8  ;;  %p718_p9 = scmp.lt.s32.totalorder %s716_s8, %s709_s29 }
  0x26   : > { %p713_p5 = pneg %p712_p4  ;;  %p719_p3 = por %p718_p9, %p717_p7 }
  0x28   : > { %p720_p0 = pnand %p719_p3, %p713_p5 }
  0x2a   : > { %723 = shalt.err (!%p720_p0)
}
  0x2b   : > { %647 = dma.hbm_to_vmem [thread:$0]  (!%p938_p6), %s936_s11, 256, %s238_s13, %s944_s16  }
  0x2c   : > { %s968_s9 = sadd.s32 4294967295, %s850_s24   ;;  %s573_s10 = sadd.s32 4294967294, %s850_s24  }
  0x2d   : > { %p43_p0 = scmp.ne.s32.totalorder %s842_s22, %s838_s21  ;;  %p1128_p3 = scmp.eq.s32.totalorder %s968_s9, 0 }
  0x2e   : > { %p177_p10 = scmp.eq.s32.totalorder %s968_s9, 1  ;;  %p183_p11 = scmp.eq.s32.totalorder %s573_s10, 1 }
  0x2f   : > { %p574_p12 = scmp.ge.s32.totalorder %s850_s24, 1  ;;  %p978_p13 = por %p1128_p3, %p43_p0 }
  0x30   : > { %p1139_p1 = scmp.ne.s32.totalorder %s846_s23, %s842_s22  ;;  %p989_p4 = por %p183_p11, %p43_p0 }
  0x31   : > { %s1138_s12 = scalar_select %p978_p13, 1, 0 }
  0x32   : > { %p985_p2 = por %p177_p10, %p1139_p1  ;;  %p190_p5 = scmp.lt.s32.totalorder %s850_s24, 3 }
  0x33   : > { %s1141_s13 = scalar_select %p989_p4, 1, 0 }
  0x34   : > { %s1140_s11 = scalar_select %p985_p2, 1, 0 }
  0x35   : > { %p994_p7 = pnand %p574_p12, %p190_p5  ;;  %s853_s18 = smov [#allocation5]  }
  0x36   : > { %s202_s19 = sshll.u32 %s853_s18, 4  ;;  %s581_s20 = sshll.u32 %s850_s24, 7  ;;  %s203_s19 = int_to_ptr.vmem [resolvable:$true] %s202_s19 }
  0x37   : > { %p640_p9 = pneg %p994_p7  ;;  %s1010_s30 = scalar_lea.hbm %s1123_s3, %s581_s20 }
  0x38   : > { %s248_s7 = scalar_lea.vmem [#allocation7], %s942_s15  ;;  %s735_s10 = scalar_lea.vmem %s203_s19, 4096 }
  0x39   : > { %p1003_p10 = pnand %p640_p9, %p1128_p3  ;;  %s255_s8 = sshll.u32 %s248_s7, 4  ;;  %s1013_s8 = int_to_ptr.vmem [resolvable:$true] %s255_s8 }
  0x3a   : > { %p736_p11 = scmp.ne.s32.totalorder %s203_s19, %s735_s10  ;;  %p743_p5 = scmp.lt.s32.totalorder %s203_s19, %s203_s19 }
  0x3b   : > { %p726_p0 = pneg %p1003_p10  ;;  %p744_p9 = scmp.lt.s32.totalorder %s735_s10, %s735_s10 }
  0x3d   : > { %p738_p12 = pnand %p736_p11, %p726_p0  ;;  %p745_p3 = por %p744_p9, %p743_p5 }
  0x3f   : > { %p739_p1 = pneg %p738_p12 }
  0x41   : > { %p746_p8 = pnand %p745_p3, %p739_p1 }
  0x43   : > { %749 = shalt.err (!%p746_p8)
}
  0x44   : > { %s854_s18 = smov 128   ;;  %s855_s15 = smov 8  }
  0x45   : > { %643 = dma.hbm_to_vmem [thread:$0]  (!%p1003_p10), %s1121_s1, 4096, %s203_s19, [#allocation6], %s854_s18, %s854_s18, %s855_s15  }
  0x46   : > { %s750_s29 = scalar_lea.hbm %s1010_s30, 128  ;;  %p1144_p11 = pneg %p938_p6 }
  0x47   : > { %p751_p0 = scmp.ne.s32.totalorder %s1010_s30, %s750_s29  ;;  %s755_s0 = scalar_lea.hbm %s1123_s3, 256 }
  0x48   : > { %p756_p8 = scmp.lt.s32.totalorder %s1010_s30, %s1123_s3  ;;  %p757_p3 = scmp.lt.s32.totalorder %s755_s0, %s750_s29 }
  0x49   : > { %p753_p12 = pnand %p751_p0, %p1144_p11 }
  0x4a   : > { %p758_p1 = por %p757_p3, %p756_p8 }
  0x4b   : > { %p754_p5 = pneg %p753_p12 }
  0x4d   : > { %p759_p9 = pnand %p758_p1, %p754_p5 }
  0x4f   : > { %762 = shalt.err (!%p759_p9)
}
  0x50   : > { %s763_s19 = scalar_lea.vmem %s1013_s8, 128  ;;  %p1145_p0 = pmov %p1144_p11 }
  0x51   : > { %p764_p10 = scmp.ne.s32.totalorder %s1013_s8, %s763_s19  ;;  %s856_s26 = smov [#allocation7]  }
  0x52   : > { %s768_s18 = sshll.u32 %s856_s26, 4  ;;  %s769_s18 = int_to_ptr.vmem [resolvable:$false] %s768_s18 }
  0x53   : > { %p766_p11 = pnand %p764_p10, %p1145_p0  ;;  %s770_s15 = scalar_lea.vmem %s769_s18, 256 }
  0x54   : > { %p771_p4 = scmp.lt.s32.totalorder %s1013_s8, %s769_s18  ;;  %p772_p2 = scmp.lt.s32.totalorder %s770_s15, %s763_s19 }
  0x55   : > { %p767_p12 = pneg %p766_p11 }
  0x56   : > { %p773_p13 = por %p772_p2, %p771_p4 }
  0x58   : > { %p774_p8 = pnand %p773_p13, %p767_p12 }
  0x5a   : > { %777 = shalt.err (!%p774_p8)
}
  0x5b   : > { %650 = dma.hbm_to_vmem [thread:$0]  (!%p938_p6), %s1010_s30, 128, %s1013_s8, %s944_s16  }
  0x5c   : > { %264 = sbr.rel (%p994_p7) target bundleno = 657 (0x291), region = 44  ;;  %s266_s0 = sand.u32 (!%p994_p7), 1, %s968_s9  }
  0x5d   : > { %s1049_s23 = sand.u32 (!%p994_p7), 1, %s842_s22   ;;  %s267_s20 = scalar_lea.sflag (!%p994_p7), [#allocation3], %s266_s0 }
  0x5e   : > { %s583_s28 = sshll.u32 (!%p994_p7), %s1049_s23, 4  ;;  %p1146_p13 = scmp.ne.s32.totalorder (!%p994_p7), %s1138_s12, 0 }
  0x5f   : > { %s1052_s27 = scalar_lea.vmem (!%p994_p7), [#allocation2], %s583_s28 }
  0x61   : > { %821 = dma.done.wait (%p1146_p13), %s267_s20, 256  }
  0x62   : > { %823 = vsyncadd (%p1146_p13), %s267_s20, 4294967040  ;;  %p1147_p6 = scmp.eq.s32.totalorder %s968_s9, 0 }
  0x64   : > { %825 = dma.done.wait (%p1147_p6), [#allocation6], 4096   ;;  %p1148_p2 = pmov %p1147_p6 }
  0x65   : > { %s585_s14 = sshll.u32 %s1049_s23, 3 }
  0x66   : > { %827 = vsyncadd (%p1148_p2), [#allocation6], 4294963200  ;;  %s1065_s16 = scalar_lea.vmem [#allocation7], %s585_s14 }
  0x67   : > { %829 = dma.done.wait (%p1146_p13), %s267_s20, 128  }
  0x68   : > { %831 = vsyncadd (%p1146_p13), %s267_s20, 4294967168  ;;  %v350_v0 = vld [vmem:[#allocation5 + $0xf8] sm:$0xff]  ;;  %v349_v2 = vld [vmem:[#allocation5 + $0xf0] sm:$0xff]  ;;  %s591_s10 = sshll.u32 %s968_s9, 7  ;;  %s316_s19 = scalar_lea.vmem [#allocation8], %s585_s14 }
  0x69   : > { %v334_v1 = vld [vmem:[#allocation5 + $0x78] sm:$0xff]  ;;  %595 = vmatprep.subr.mxu0 %v350_v0  ;;  %v333_v3 = vld [vmem:[#allocation5 + $0x70] sm:$0xff]  ;;  %v348_v4 = vld [vmem:[#allocation5 + $0xe8] sm:$0xff]  ;;  %s473_s26 = sshll.u32 %s316_s19, 4  ;;  %s471_s0 = scalar_lea.hbm %s1126_s6, %s591_s10  ;;  %s474_s26 = int_to_ptr.vmem [resolvable:$true] %s473_s26 }
  0x6a   : > { %596 = vmatpush3.msra.mxu0 %v334_v1  ;;  %v332_v5 = vld [vmem:[#allocation5 + $0x68] sm:$0xff]  ;;  %v347_v6 = vld [vmem:[#allocation5 + $0xe0] sm:$0xff]  ;;  %v346_v8 = vld [vmem:[#allocation5 + $0xd8] sm:$0xff]  ;;  %s460_s28 = scalar_lea.sflag [#allocation4], %s1049_s23  ;;  %s778_s20 = scalar_lea.vmem %s474_s26, 128 }
  0x6b   : > { %597 = vmatprep.subr.mxu0 %v349_v2  ;;  %v331_v7 = vld [vmem:[#allocation5 + $0x60] sm:$0xff]  ;;  %v330_v9 = vld [vmem:[#allocation5 + $0x58] sm:$0xff]  ;;  %v345_v10 = vld [vmem:[#allocation5 + $0xd0] sm:$0xff]  ;;  %p779_p4 = scmp.ne.s32.totalorder %s474_s26, %s778_s20  ;;  %p1149_p7 = scmp.ne.s32.totalorder %s1140_s11, 0 }
  0x6c   : > { %598 = vmatpush3.msra.mxu0 %v333_v3  ;;  %v329_v11 = vld [vmem:[#allocation5 + $0x50] sm:$0xff]  ;;  %v344_v12 = vld [vmem:[#allocation5 + $0xc8] sm:$0xff]  ;;  %v343_v15 = vld [vmem:[#allocation5 + $0xc0] sm:$0xff] }
  0x6d   : > { %599 = vmatprep.subr.mxu0 %v348_v4  ;;  %v318_v13 = vld [vmem:[%s1052_s27 + $0x8] sm:$0xff]  ;;  %v327_v16 = vld [vmem:[#allocation5 + $0x40] sm:$0xff]  ;;  %v341_v19 = vld [vmem:[#allocation5 + $0xb0] sm:$0xff]  ;;  %p780_p5 = pnand %p779_p4, %p1149_p7 }
  0x6e   : > { %600 = vmatpush3.msra.mxu0 %v332_v5  ;;  %v328_v14 = vld [vmem:[#allocation5 + $0x48] sm:$0xff]  ;;  %422 = vmatprep.mubr.f32.mxu0 %v318_v13  ;;  %v342_v17 = vld [vmem:[#allocation5 + $0xb8] sm:$0xff]  ;;  %v325_v20 = vld [vmem:[#allocation5 + $0x30] sm:$0xff] }
  0x6f   : > { %601 = vmatprep.subr.mxu0 %v347_v6  ;;  %v326_v18 = vld [vmem:[#allocation5 + $0x38] sm:$0xff]  ;;  %v340_v21 = vld [vmem:[#allocation5 + $0xa8] sm:$0xff]  ;;  %v339_v23 = vld [vmem:[#allocation5 + $0xa0] sm:$0xff]  ;;  %p781_p3 = pneg %p780_p5 }
  0x70   : > { %602 = vmatpush3.msra.mxu0 %v331_v7  ;;  %v324_v22 = vld [vmem:[#allocation5 + $0x28] sm:$0xff]  ;;  %v323_v24 = vld [vmem:[#allocation5 + $0x20] sm:$0xff]  ;;  %v338_v25 = vld [vmem:[#allocation5 + $0x98] sm:$0xff] }
  0x71   : > { %603 = vmatprep.subr.mxu0 %v346_v8  ;;  %v322_v26 = vld [vmem:[#allocation5 + $0x18] sm:$0xff]  ;;  %v337_v27 = vld [vmem:[#allocation5 + $0x90] sm:$0xff]  ;;  %v336_v29 = vld [vmem:[#allocation5 + $0x88] sm:$0xff] }
  0x72   : > { %604 = vmatpush3.msra.mxu0 %v330_v9  ;;  %v321_v28 = vld [vmem:[#allocation5 + $0x10] sm:$0xff]  ;;  %v320_v30 = vld [vmem:[#allocation5 + $0x8] sm:$0xff]  ;;  %v335_v31 = vld [vmem:[#allocation5 + $0x80] sm:$0xff] }
  0x73   : > { %605 = vmatprep.subr.mxu0 %v345_v10  ;;  %v319_v32 = vld [vmem:[#allocation5] sm:$0xff] }
  0x74   : > { %606 = vmatpush3.msra.mxu0 %v329_v11  ;;  %v317_v33 = vld [vmem:[%s1052_s27] sm:$0xff]  ;;  %s857_s27 = smov [#allocation8]  }
  0x75   : > { %607 = vmatprep.subr.mxu0 %v344_v12  ;;  %v587_v35 = vld [vmem:[%s1122_s2] ss:$0 sm:$0xff] }
  0x76   : > { %608 = vmatpush3.msra.mxu0 %v328_v14  ;;  %v428_v38 = vld [vmem:[%s1065_s16] sm:$0xff]  ;;  %s782_s16 = sshll.u32 %s857_s27, 4  ;;  %s783_s16 = int_to_ptr.vmem [resolvable:$false] %s782_s16 }
  0x77   : > { %609 = vmatprep.subr.mxu0 %v343_v15  ;;  %v588_v49 = vld [vmem:[%s1124_s4] ss:$0 sm:$0xff]  ;;  %s784_s9 = scalar_lea.vmem %s783_s16, 256  ;;  %p785_p1 = scmp.lt.s32.totalorder %s474_s26, %s783_s16 }
  0x78   : > { %610 = vmatpush3.msra.mxu0 %v327_v16  ;;  %v589_v51 = vld [vmem:[%s1125_s5] ss:$0 sm:$0xff]  ;;  %p786_p9 = scmp.lt.s32.totalorder %s784_s9, %s778_s20 }
  0x79   : > { %611 = vmatprep.subr.mxu0 %v342_v17 }
  0x7a   : > { %612 = vmatpush3.msra.mxu0 %v326_v18  ;;  %p787_p10 = por %p786_p9, %p785_p1 }
  0x7b   : > { %613 = vmatprep.subr.mxu0 %v341_v19 }
  0x7c   : > { %614 = vmatpush3.msra.mxu0 %v325_v20  ;;  %p788_p0 = pnand %p787_p10, %p781_p3 }
  0x7d   : > { %615 = vmatprep.subr.mxu0 %v340_v21 }
  0x7e   : > { %616 = vmatpush3.msra.mxu0 %v324_v22 }
  0x7f   : > { %617 = vmatprep.subr.mxu0 %v339_v23 }
  0x80   : > { %618 = vmatpush3.msra.mxu0 %v323_v24 }
  0x81   : > { %619 = vmatprep.subr.mxu0 %v338_v25 }
  0x82   : > { %620 = vmatpush3.msra.mxu0 %v322_v26 }
  0x83   : > { %621 = vmatprep.subr.mxu0 %v337_v27 }
  0x84   : > { %622 = vmatpush3.msra.mxu0 %v321_v28 }
  0x85   : > { %623 = vmatprep.subr.mxu0 %v336_v29 }
  0x86   : > { %624 = vmatpush3.msra.mxu0 %v320_v30 }
  0x87   : > { %625 = vmatprep.subr.mxu0 %v335_v31 }
  0x88   : > { %626 = vmatpush3.msra.mxu0 %v319_v32 }
  0x89   : > { %423 = vmatmul.mubr.f32.vlgmr.msra.gmra.mxu0 %v317_v33 }
 0x149   : > { %v627_v34 = vpop.f32.mrf.mxu0 }
 0x14b   : > { %v628_v36 = vpop.f32.mrf.mxu0 }
 0x14c   : > { %v629_v37 = vadd.f32 %v628_v36, %v627_v34 }
 0x14e   : > { %v425_v39 = vadd.f32 %v629_v37, %v587_v35 }
 0x150   : > { %v429_v40 = vadd.f32 %v428_v38, %v425_v39 }
 0x152   : > { %430 = vadd.xlane.f32.xlu0 %v429_v40 }
 0x1db   : > { %v431_v41 = vpop.xlane.xlu0 %430 }
 0x1dc   : > { %v433_v42 = vmul.f32 0.0078125, %v431_v41 }
 0x1de   : > { %v434_v43 = vsub.f32 %v429_v40, %v433_v42 }
 0x1e0   : > { %v435_v44 = vmul.f32 %v434_v43, %v434_v43 }
 0x1e2   : > { %436 = vadd.xlane.f32.xlu0 %v435_v44 }
 0x26b   : > { %v437_v45 = vpop.xlane.xlu0 %436 }
 0x26c   : > { %v438_v46 = vmul.f32 0.0078125, %v437_v45 }
 0x26e   : > { %v439_v47 = vadd.f32 1e-12, %v438_v46 }
 0x270   : > { %694 = vrsqrt.f32 %v439_v47 }
 0x27d   : > { %v695_v48 = vpop.eup %694 }
 0x27e   : > { %v441_v50 = vmul.f32 %v695_v48, %v434_v43 }
 0x280   : > { %v449_v52 = vmul.f32 %v588_v49, %v441_v50 }
 0x282   : > { %v457_v53 = vadd.f32 %v589_v51, %v449_v52 }
 0x284   : > { %458 = vst [vmem:[%s316_s19] sm:$0xff] %v457_v53 }
 0x285   : > { %791 = shalt.err (!%p788_p0)
}
 0x286   : > { %s792_s14 = scalar_lea.hbm %s471_s0, 128  ;;  %s796_s17 = scalar_lea.hbm %s1126_s6, 256 }
 0x287   : > { %p793_p11 = scmp.ne.s32.totalorder %s471_s0, %s792_s14  ;;  %p797_p13 = scmp.lt.s32.totalorder %s471_s0, %s1126_s6 }
 0x288   : > { %p798_p6 = scmp.lt.s32.totalorder %s796_s17, %s792_s14 }
 0x289   : > { %p794_p12 = pnand %p793_p11, %p1149_p7 }
 0x28a   : > { %p799_p2 = por %p798_p6, %p797_p13 }
 0x28b   : > { %p795_p8 = pneg %p794_p12 }
 0x28d   : > { %p800_p4 = pnand %p799_p2, %p795_p8 }
 0x28f   : > { %803 = shalt.err (!%p800_p4)
}
 0x290   : > { %638 = dma.vmem_to_hbm [thread:$0]  (%p1149_p7), %s474_s26, 128, %s471_s0, %s460_s28  }
 0x291 PF: > { %s485_s29 = sand.u32 1, %s838_s21   ;;  %p1150_p5 = scmp.ne.s32.totalorder %s1141_s13, 0 }
 0x292   : > { %p1151_p3 = scmp.ge.s32.totalorder %s850_s24, 2  ;;  %s486_s7 = scalar_lea.sflag [#allocation4], %s485_s29 }
 0x294   : > { %p652_p1 = pnand %p1151_p3, %p1150_p5 }
 0x296   : > { %p653_p9 = pneg %p652_p1 }
 0x298   : > { %833 = dma.done.wait (%p653_p9), %s486_s7, 128  }
 0x299   : > { %835 = vsyncadd (%p653_p9), %s486_s7, 4294967168  ;;  %s1152_s10 = sld [smem:[#allocation13_spill]]  ;;  %p20_p10 = scmp.ge.s32.totalorder %s914_s25, 4  }
 0x29a   : > { %s1153_s23 = sld [smem:[#allocation14_spill]]  ;;  %s1154_s21 = smov %s842_s22 }
 0x29b   : > { %s1156_s24 = smov %s914_s25  ;;  %22 = sbr.rel (!%p20_p10) target bundleno = 8 (0x8), region = 104 }
 0x29f   : > { %s1155_s22 = smov %s1152_s10 }
 0x2a0   :  { %491 = vsyncpa [#allocation3], 1 }
 0x2a1   :  { %493 = vsyncpa [#allocation3 + $0x1], 1 }
 0x2a2   :  { %494 = vsyncpa [#allocation6], 1 }
 0x2a3   :  { %495 = vsyncpa [#allocation4], 1 }
 0x2a4   :  { %497 = vsyncpa [#allocation4 + $0x1], 1 }

</bundles_post_ra>
